<compile_context>
chip_gen: v7x
topology: tpu7x:2x2x1
jax: 0.10.0
libtpu: 0.0.40
codegen_flags: <defaults>
</compile_context>

<pallas_src>
import functools

import jax
import jax.numpy as jnp
from jax.experimental import pallas as pl
from jax.experimental.pallas import tpu as pltpu

_SQRT_HALF = 0.7071067811865476


def _round_up(x, m):
    return (x + m - 1) // m * m


def _vmem_capacity_bytes():
    try:
        return int(pltpu.get_tpu_info().vmem_capacity_bytes)
    except Exception:
        return None


def _tile_config():
    cap = _vmem_capacity_bytes()
    if cap is None or cap <= 64 * 2**20:
        # v7x (64 MiB VMEM per TensorCore) or unknown generation: narrower
        # tiles, leave headroom for Mosaic internal scratch + pipeline buffers.
        return dict(row_tile=256, vocab_tile=1024, k_tile=512,
                    vmem_limit=40 * 2**20)
    # v5e / v6e: 128 MiB physical VMEM -> bigger tiles, fewer grid steps.
    return dict(row_tile=512, vocab_tile=2048, k_tile=512,
                vmem_limit=96 * 2**20)


def _pick_tile(total, target, align):
    """(tile, padded_total): largest aligned divisor of total <= target, else pad."""
    if total <= target:
        return total, total
    t = (target // align) * align
    while t >= align:
        if total % t == 0:
            return t, total
        t -= align
    return target, _round_up(total, target)


def _pick_k_tile(total, target):
    """Contraction tile: 128-aligned divisor of H, or full H (never pad K)."""
    if total <= target:
        return total
    t = (target // 128) * 128
    while t >= 128:
        if total % t == 0:
            return t
        t -= 128
    return total


def _prologue_kernel(h_ref, w1_ref, b1_ref, g_ref, beta_ref, x_ref, acc_ref,
                     *, eps):
    """dense (K-tiled) -> exact GELU -> LayerNorm on one [tm, H] row block."""
    k = pl.program_id(1)

    @pl.when(k == 0)
    def _():
        acc_ref[...] = jnp.zeros_like(acc_ref)

    acc_ref[...] += jnp.dot(h_ref[...], w1_ref[...],
                            preferred_element_type=jnp.float32)

    @pl.when(k == pl.num_programs(1) - 1)
    def _():
        x = acc_ref[...] + b1_ref[...]
        # exact (erf-based) GELU, matching torch.nn.GELU() default
        x = 0.5 * x * (1.0 + jax.lax.erf(x * _SQRT_HALF))
        mean = jnp.mean(x, axis=-1, keepdims=True)
        var = jnp.mean(jnp.square(x - mean), axis=-1, keepdims=True)
        x = (x - mean) * jax.lax.rsqrt(var + eps)
        x = x * g_ref[...] + beta_ref[...]
        x_ref[...] = x.astype(x_ref.dtype)


def _decoder_kernel(x_ref, w2_ref, b2_ref, out_ref):
    """[tm, H] @ [H, tv] + [1, tv]; f32 accumulation on the MXU."""
    logits = jnp.dot(x_ref[...], w2_ref[...], preferred_element_type=jnp.float32)
    out_ref[...] = (logits + b2_ref[...]).astype(out_ref.dtype)


def prepare_lm_head_params(params, *, decoder_dtype=jnp.bfloat16,
                           dense_dtype=jnp.float32, vocab_tile=None):
    """One-time weight prep (cast + vocab pad) so lm_head never copies weights."""
    if vocab_tile is None:
        vocab_tile = _tile_config()["vocab_tile"]
    H = params["w_dense"].shape[0]
    V = params["w_dec"].shape[1]
    _, Vp = _pick_tile(V, vocab_tile, 128)
    w2 = params["w_dec"].astype(decoder_dtype)                 # [H, V] stream dtype
    b2 = params["b_dec"].reshape(1, V).astype(jnp.float32)
    if Vp != V:
        # zero-pad the vocab axis ONCE here (not per forward call)
        w2 = jnp.pad(w2, ((0, 0), (0, Vp - V)))
        b2 = jnp.pad(b2, ((0, 0), (0, Vp - V)))
    return {
        "w_dense": params["w_dense"].astype(dense_dtype),                 # [H, H]
        "b_dense": params["b_dense"].reshape(1, H).astype(jnp.float32),   # [1, H]
        "ln_gamma": params["ln_gamma"].reshape(1, H).astype(jnp.float32),
        "ln_beta": params["ln_beta"].reshape(1, H).astype(jnp.float32),
        "w_dec": w2,                                                      # [H, Vp]
        "b_dec": b2,                                                      # [1, Vp]
    }


def lm_head(hidden_state, params, *, eps=1e-6, vocab_size=None,
            out_dtype=jnp.float32, row_tile=None, vocab_tile=None,
            k_tile=None, vmem_limit_bytes=None):
    """hidden_state [B, S, H] -> logits [B, S, V].

    `params` must come from prepare_lm_head_params (weights already cast and,
    if needed, vocab-padded).  `vocab_size` is the logical (unpadded) V.
    """
    cfg = _tile_config()
    row_tile = row_tile or cfg["row_tile"]
    vocab_tile = vocab_tile or cfg["vocab_tile"]
    k_tile = k_tile or cfg["k_tile"]
    vmem_limit_bytes = vmem_limit_bytes or cfg["vmem_limit"]

    B, S, H = hidden_state.shape
    w1, b1 = params["w_dense"], params["b_dense"]
    g, beta = params["ln_gamma"], params["ln_beta"]
    w2, b2 = params["w_dec"], params["b_dec"]
    Vp = w2.shape[1]
    V = Vp if vocab_size is None else vocab_size
    stream_dtype = w2.dtype            # decoder-weight / intermediate stream dtype

    M = B * S
    h2d = hidden_state.reshape(M, H).astype(w1.dtype)

    # --- row (M) tiling: prefer an exact divisor; pad activations only as fallback
    tm, Mp = _pick_tile(M, row_tile, 8)
    if Mp != M:
        h2d = jnp.pad(h2d, ((0, Mp - M), (0, 0)))

    # --- vocab (V) tiling: weights were padded once in prepare, never here ---
    tv, _ = _pick_tile(Vp, vocab_tile, 128)
    assert Vp % tv == 0

    # --- contraction (H) tiling for the prologue dense matmul ----------------
    tk = _pick_k_tile(H, k_tile)

    def cparams(sem):
        return pltpu.CompilerParams(dimension_semantics=sem,
                                    vmem_limit_bytes=vmem_limit_bytes)

    # Stage 1: dense -> GELU -> LayerNorm  (rows parallel, K innermost)
    x = pl.pallas_call(
        functools.partial(_prologue_kernel, eps=eps),
        out_shape=jax.ShapeDtypeStruct((Mp, H), stream_dtype),
        grid_spec=pltpu.PrefetchScalarGridSpec(
            num_scalar_prefetch=0,
            grid=(Mp // tm, H // tk),
            in_specs=[
                pl.BlockSpec((tm, tk), lambda i, k: (i, k)),   # hidden rows
                pl.BlockSpec((tk, H), lambda i, k: (k, 0)),    # dense W slab
                pl.BlockSpec((1, H), lambda i, k: (0, 0)),     # dense b
                pl.BlockSpec((1, H), lambda i, k: (0, 0)),     # ln gamma
                pl.BlockSpec((1, H), lambda i, k: (0, 0)),     # ln beta
            ],
            out_specs=pl.BlockSpec((tm, H), lambda i, k: (i, 0)),
            scratch_shapes=[pltpu.VMEM((tm, H), jnp.float32)],
        ),
        compiler_params=cparams(("parallel", "arbitrary")),
    )(h2d, w1, b1, g, beta)

    # Stage 2: decoder projection.  Grid = (vocab, rows): rows innermost so the
    # big W_dec tile index is constant across consecutive steps -> W_dec is
    # streamed from HBM exactly once per call.
    logits = pl.pallas_call(
        _decoder_kernel,
        out_shape=jax.ShapeDtypeStruct((Mp, Vp), out_dtype),
        grid_spec=pltpu.PrefetchScalarGridSpec(
            num_scalar_prefetch=0,
            grid=(Vp // tv, Mp // tm),
            in_specs=[
                pl.BlockSpec((tm, H), lambda j, i: (i, 0)),    # normalized x
                pl.BlockSpec((H, tv), lambda j, i: (0, j)),    # decoder W tile
                pl.BlockSpec((1, tv), lambda j, i: (0, j)),    # decoder b tile
            ],
            out_specs=pl.BlockSpec((tm, tv), lambda j, i: (i, j)),
        ),
        compiler_params=cparams(("parallel", "parallel")),
    )(x, w2, b2)

    if Mp != M or Vp != V:
        logits = logits[:M, :V]
    return logits.reshape(B, S, V)


def init_params(key, hidden_size, vocab_size):
    k1, k2, k3 = jax.random.split(key, 3)
    return {
        # dense: nn.Linear(H, H); stored as [in, out]
        "w_dense": jax.random.normal(k1, (hidden_size, hidden_size),
                                     jnp.float32) * 0.02,
        "b_dense": jax.random.normal(k2, (hidden_size,), jnp.float32) * 0.02,
        # LayerNorm defaults: gamma = 1, beta = 0
        "ln_gamma": jnp.ones((hidden_size,), jnp.float32),
        "ln_beta": jnp.zeros((hidden_size,), jnp.float32),
        # decoder: nn.Linear(H, V); stored as [in, out]
        "w_dec": jax.random.normal(k3, (hidden_size, vocab_size),
                                   jnp.float32) * 0.02,
        # self.bias = nn.Parameter(torch.zeros(vocab_size)); decoder.bias = bias
        "b_dec": jnp.zeros((vocab_size,), jnp.float32),
    }


def lm_head_ref(hidden_state, params, *, eps=1e-6):
    x = hidden_state @ params["w_dense"] + params["b_dense"]
    x = 0.5 * x * (1.0 + jax.lax.erf(x / jnp.sqrt(2.0)))
    mean = jnp.mean(x, axis=-1, keepdims=True)
    var = jnp.mean(jnp.square(x - mean), axis=-1, keepdims=True)
    x = (x - mean) * jax.lax.rsqrt(var + eps)
    x = x * params["ln_gamma"] + params["ln_beta"]
    return x @ params["w_dec"] + params["b_dec"]


if __name__ == "__main__":
    B, S, H, V = 2, 8, 32, 256
    key = jax.random.PRNGKey(0)
    k_h, k_p = jax.random.split(key)

    hidden_state = jax.random.normal(k_h, (B, S, H), jnp.float32)
    params = init_params(k_p, H, V)
    ref = lm_head_ref(hidden_state, params)

    # f32 weight-streaming path: close match against the pure-JAX reference.
    prep_f32 = prepare_lm_head_params(params, decoder_dtype=jnp.float32)
    logits = jax.block_until_ready(lm_head(hidden_state, prep_f32, vocab_size=V))
    assert logits.shape == (B, S, V), logits.shape
    assert jnp.allclose(logits, ref, atol=2e-3, rtol=2e-3), (
        float(jnp.max(jnp.abs(logits - ref))))

    # Default bf16 weight/activation streaming path (memory-bound fast path).
    prep_bf16 = prepare_lm_head_params(params)
    logits_bf16 = jax.block_until_ready(
        lm_head(hidden_state, prep_bf16, vocab_size=V))
    assert logits_bf16.shape == (B, S, V), logits_bf16.shape
    assert jnp.allclose(logits_bf16, ref, atol=3e-2, rtol=3e-2), (
        float(jnp.max(jnp.abs(logits_bf16 - ref))))

    print("KERNEL_OK")
</pallas_src>

<mosaic_0001>
module attributes {stable_mosaic.version = 11 : i64} {
  func.func @_prologue_kernel(%arg0: i32, %arg1: i32, %arg2: memref<16x32xf32, #tpu.memory_space<vmem>>, %arg3: memref<32x32xf32, #tpu.memory_space<vmem>>, %arg4: memref<1x32xf32, #tpu.memory_space<vmem>>, %arg5: memref<1x32xf32, #tpu.memory_space<vmem>>, %arg6: memref<1x32xf32, #tpu.memory_space<vmem>>, %arg7: memref<16x32xf32, #tpu.memory_space<vmem>>, %arg8: memref<16x32xf32, #tpu.memory_space<vmem>>) attributes {dimension_semantics = [#tpu.dimension_semantics<parallel>, #tpu.dimension_semantics<arbitrary>], iteration_bounds = array<i64: 1, 1>, scalar_prefetch = 0 : i64, scratch_operands = 1 : i64, tpu.core_type = #tpu.core_type<tc>, window_params = [{transform_indices = @transform_0, window_bounds = array<i64: 16, 32>}, {transform_indices = @transform_1, window_bounds = array<i64: 32, 32>}, {pipeline_mode = #tpu.pipeline_mode<synchronous>, transform_indices = @transform_2, window_bounds = array<i64: 1, 32>}, {pipeline_mode = #tpu.pipeline_mode<synchronous>, transform_indices = @transform_3, window_bounds = array<i64: 1, 32>}, {pipeline_mode = #tpu.pipeline_mode<synchronous>, transform_indices = @transform_4, window_bounds = array<i64: 1, 32>}, {transform_indices = @transform_5, window_bounds = array<i64: 16, 32>}]} {
    %c0_i32 = arith.constant 0 : i32
    %0 = arith.cmpi eq, %arg1, %c0_i32 : i32
    %1 = arith.extui %0 : i1 to i32
    %c0_i32_0 = arith.constant 0 : i32
    %2 = arith.cmpi ne, %1, %c0_i32_0 : i32
    scf.if %2 {
      %cst_10 = arith.constant 0.000000e+00 : f32
      %12 = vector.broadcast %cst_10 : f32 to vector<16x32xf32>
      %c0_11 = arith.constant 0 : index
      %c0_12 = arith.constant 0 : index
      %13 = vector.load %arg8[%c0_11, %c0_12] : memref<16x32xf32, #tpu.memory_space<vmem>>, vector<16x32xf32>
      tpu.vector_store %arg8[%c0_11, %c0_12], %12 {strides = array<i32>} : memref<16x32xf32, #tpu.memory_space<vmem>>, vector<16x32xf32>,
    } else {
    }
    %c0 = arith.constant 0 : index
    %c0_1 = arith.constant 0 : index
    %3 = vector.load %arg8[%c0, %c0_1] : memref<16x32xf32, #tpu.memory_space<vmem>>, vector<16x32xf32>
    %c0_2 = arith.constant 0 : index
    %c0_3 = arith.constant 0 : index
    %4 = vector.load %arg2[%c0_2, %c0_3] : memref<16x32xf32, #tpu.memory_space<vmem>>, vector<16x32xf32>
    %c0_4 = arith.constant 0 : index
    %c0_5 = arith.constant 0 : index
    %5 = vector.load %arg3[%c0_4, %c0_5] : memref<32x32xf32, #tpu.memory_space<vmem>>, vector<32x32xf32>
    %cst = arith.constant dense<0.000000e+00> : vector<16x32xf32>
    %6 = tpu.matmul %4, %5, %cst {dimension_numbers = #tpu.dot_dimension_numbers<[1], [0], [0], [1], [0, 0, 1, 1], [], []>} : vector<16x32xf32>, vector<32x32xf32>, vector<16x32xf32> -> vector<16x32xf32>
    %7 = arith.addf %3, %6 : vector<16x32xf32>
    %c0_6 = arith.constant 0 : index
    %c0_7 = arith.constant 0 : index
    %8 = vector.load %arg8[%c0_6, %c0_7] : memref<16x32xf32, #tpu.memory_space<vmem>>, vector<16x32xf32>
    tpu.vector_store %arg8[%c0_6, %c0_7], %7 {strides = array<i32>} : memref<16x32xf32, #tpu.memory_space<vmem>>, vector<16x32xf32>,
    %c0_i32_8 = arith.constant 0 : i32
    %9 = arith.cmpi eq, %arg1, %c0_i32_8 : i32
    %10 = arith.extui %9 : i1 to i32
    %c0_i32_9 = arith.constant 0 : i32
    %11 = arith.cmpi ne, %10, %c0_i32_9 : i32
    scf.if %11 {
      %c0_10 = arith.constant 0 : index
      %c0_11 = arith.constant 0 : index
      %12 = vector.load %arg8[%c0_10, %c0_11] : memref<16x32xf32, #tpu.memory_space<vmem>>, vector<16x32xf32>
      %c0_12 = arith.constant 0 : index
      %c0_13 = arith.constant 0 : index
      %13 = vector.load %arg4[%c0_12, %c0_13] : memref<1x32xf32, #tpu.memory_space<vmem>>, vector<1x32xf32>
      %14 = vector.broadcast %13 : vector<1x32xf32> to vector<16x32xf32>
      %15 = arith.addf %12, %14 : vector<16x32xf32>
      %cst_14 = arith.constant 5.000000e-01 : f32
      %16 = vector.broadcast %cst_14 : f32 to vector<16x32xf32>
      %17 = arith.mulf %16, %15 : vector<16x32xf32>
      %cst_15 = arith.constant 0.707106769 : f32
      %18 = vector.broadcast %cst_15 : f32 to vector<16x32xf32>
      %19 = arith.mulf %15, %18 : vector<16x32xf32>
      %20 = math.erf %19 : vector<16x32xf32>
      %cst_16 = arith.constant 1.000000e+00 : f32
      %21 = vector.broadcast %cst_16 : f32 to vector<16x32xf32>
      %22 = arith.addf %21, %20 : vector<16x32xf32>
      %23 = arith.mulf %17, %22 : vector<16x32xf32>
      %cst_17 = arith.constant dense<0.000000e+00> : vector<16xf32>
      %24 = vector.multi_reduction <add>, %23, %cst_17 [1] : vector<16x32xf32> to vector<16xf32>
      %25 = vector.shape_cast %24 : vector<16xf32> to vector<16x1xf32>
      %cst_18 = arith.constant 3.200000e+01 : f32
      %26 = vector.broadcast %cst_18 : f32 to vector<16x1xf32>
      %27 = arith.divf %25, %26 : vector<16x1xf32>
      %28 = vector.broadcast %27 : vector<16x1xf32> to vector<16x32xf32>
      %29 = arith.subf %23, %28 : vector<16x32xf32>
      %30 = arith.mulf %29, %29 : vector<16x32xf32>
      %cst_19 = arith.constant dense<0.000000e+00> : vector<16xf32>
      %31 = vector.multi_reduction <add>, %30, %cst_19 [1] : vector<16x32xf32> to vector<16xf32>
      %32 = vector.shape_cast %31 : vector<16xf32> to vector<16x1xf32>
      %cst_20 = arith.constant 3.200000e+01 : f32
      %33 = vector.broadcast %cst_20 : f32 to vector<16x1xf32>
      %34 = arith.divf %32, %33 : vector<16x1xf32>
      %35 = vector.broadcast %27 : vector<16x1xf32> to vector<16x32xf32>
      %36 = arith.subf %23, %35 : vector<16x32xf32>
      %cst_21 = arith.constant 9.99999997E-7 : f32
      %37 = vector.broadcast %cst_21 : f32 to vector<16x1xf32>
      %38 = arith.addf %34, %37 : vector<16x1xf32>
      %39 = math.rsqrt %38 : vector<16x1xf32>
      %40 = vector.broadcast %39 : vector<16x1xf32> to vector<16x32xf32>
      %41 = arith.mulf %36, %40 : vector<16x32xf32>
      %c0_22 = arith.constant 0 : index
      %c0_23 = arith.constant 0 : index
      %42 = vector.load %arg5[%c0_22, %c0_23] : memref<1x32xf32, #tpu.memory_space<vmem>>, vector<1x32xf32>
      %43 = vector.broadcast %42 : vector<1x32xf32> to vector<16x32xf32>
      %44 = arith.mulf %41, %43 : vector<16x32xf32>
      %c0_24 = arith.constant 0 : index
      %c0_25 = arith.constant 0 : index
      %45 = vector.load %arg6[%c0_24, %c0_25] : memref<1x32xf32, #tpu.memory_space<vmem>>, vector<1x32xf32>
      %46 = vector.broadcast %45 : vector<1x32xf32> to vector<16x32xf32>
      %47 = arith.addf %44, %46 : vector<16x32xf32>
      %c0_26 = arith.constant 0 : index
      %c0_27 = arith.constant 0 : index
      %48 = vector.load %arg7[%c0_26, %c0_27] : memref<16x32xf32, #tpu.memory_space<vmem>>, vector<16x32xf32>
      tpu.vector_store %arg7[%c0_26, %c0_27], %47 {strides = array<i32>} : memref<16x32xf32, #tpu.memory_space<vmem>>, vector<16x32xf32>,
    } else {
    }
    return
  }
  func.func @transform_0(%arg0: i32, %arg1: i32) -> (i32, i32) {
    %c0_i32 = arith.constant 0 : i32
    return %arg0, %arg1 : i32, i32
  }
  func.func @transform_1(%arg0: i32, %arg1: i32) -> (i32, i32) {
    %c0_i32 = arith.constant 0 : i32
    %c0_i32_0 = arith.constant 0 : i32
    return %arg1, %c0_i32 : i32, i32
  }
  func.func @transform_2(%arg0: i32, %arg1: i32) -> (i32, i32) {
    %c0_i32 = arith.constant 0 : i32
    %c0_i32_0 = arith.constant 0 : i32
    %c0_i32_1 = arith.constant 0 : i32
    return %c0_i32, %c0_i32_0 : i32, i32
  }
  func.func @transform_3(%arg0: i32, %arg1: i32) -> (i32, i32) {
    %c0_i32 = arith.constant 0 : i32
    %c0_i32_0 = arith.constant 0 : i32
    %c0_i32_1 = arith.constant 0 : i32
    return %c0_i32, %c0_i32_0 : i32, i32
  }
  func.func @transform_4(%arg0: i32, %arg1: i32) -> (i32, i32) {
    %c0_i32 = arith.constant 0 : i32
    %c0_i32_0 = arith.constant 0 : i32
    %c0_i32_1 = arith.constant 0 : i32
    return %c0_i32, %c0_i32_0 : i32, i32
  }
  func.func @transform_5(%arg0: i32, %arg1: i32) -> (i32, i32) {
    %c0_i32 = arith.constant 0 : i32
    %c0_i32_0 = arith.constant 0 : i32
    return %arg0, %c0_i32 : i32, i32
  }
}

</mosaic_0001>

<bundles_post_ra>
// kernel: tpu_custom_call.1
= control target key start
LH: loop header
LB: loop body
LE: loop exit
PB: predicated region body
PF: predicated region fallthrough
CT: control target
= control target key end

     0   :  { %10 = vsyncpa [#allocation4], 0  ;;  %s457_s0 = inlined_call_operand.hbm [shape: f32[16,32], index: 0, kind: input, shape index: {}]   ;;  %s458_s1 = inlined_call_operand.hbm [shape: f32[32,32], index: 1, kind: input, shape index: {}]   ;;  %s459_s2 = inlined_call_operand.vmem [shape: f32[1,32], index: 2, kind: input, shape index: {}]   ;;  %s460_s3 = inlined_call_operand.vmem [shape: f32[1,32], index: 3, kind: input, shape index: {}]   ;;  %s461_s4 = inlined_call_operand.vmem [shape: f32[1,32], index: 4, kind: input, shape index: {}]   ;;  %s462_s5 = inlined_call_operand.hbm [shape: f32[16,32], index: 5, kind: output, shape index: {}]  }
   0x1   :  { %11 = vsyncpa [#allocation7], 0 }
   0x2   :  { %12 = vsyncpa [#allocation5], 0  ;;  %s355_s18 = smov [#allocation3]   ;;  %s283_s22 = scalar_lea.hbm %s457_s0, 256 }
   0x3   :  { %s18_s19 = sshll.u32 %s355_s18, 4  ;;  %p284_p0 = scmp.ne.s32.totalorder %s457_s0, %s283_s22  ;;  %s19_s19 = int_to_ptr.vmem [resolvable:$true] %s18_s19 }
   0x4   :  { %p287_p1 = scmp.lt.u32.totalorder %s283_s22, %s457_s0 }
   0x6   :  { %p289_p2 = pnand %p287_p1, %p284_p0 }
   0x8   :  { %292 = shalt.err (!%p289_p2)
}
   0x9   :  { %s293_s27 = scalar_lea.vmem %s19_s19, 256  ;;  %p298_p4 = scmp.lt.s32.totalorder %s19_s19, %s19_s19 }
   0xa   :  { %p294_p3 = scmp.ne.s32.totalorder %s19_s19, %s293_s27  ;;  %p299_p5 = scmp.lt.s32.totalorder %s293_s27, %s293_s27 }
   0xc   :  { %p300_p6 = por %p299_p5, %p298_p4 }
   0xe   :  { %p301_p7 = pnand %p300_p6, %p294_p3 }
  0x10   :  { %304 = shalt.err (!%p301_p7)
}
  0x11   :  { %s356_s28 = smov 128   ;;  %s357_s29 = smov 8  }
  0x12   :  { %24 = dma.hbm_to_vmem [thread:$0]  %s457_s0, 256, %s19_s19, [#allocation4], %s356_s28, %s356_s28, %s357_s29  }
  0x13   :  { %s358_s7 = smov [#allocation6]   ;;  %s305_s11 = scalar_lea.hbm %s458_s1, 512 }
  0x14   :  { %s30_s8 = sshll.u32 %s358_s7, 4  ;;  %p306_p8 = scmp.ne.s32.totalorder %s458_s1, %s305_s11  ;;  %s31_s8 = int_to_ptr.vmem [resolvable:$true] %s30_s8 }
  0x15   :  { %p309_p9 = scmp.lt.u32.totalorder %s305_s11, %s458_s1 }
  0x17   :  { %p311_p10 = pnand %p309_p9, %p306_p8 }
  0x19   :  { %314 = shalt.err (!%p311_p10)
}
  0x1a   :  { %s315_s16 = scalar_lea.vmem %s31_s8, 512  ;;  %p320_p12 = scmp.lt.s32.totalorder %s31_s8, %s31_s8 }
  0x1b   :  { %p316_p11 = scmp.ne.s32.totalorder %s31_s8, %s315_s16  ;;  %p321_p13 = scmp.lt.s32.totalorder %s315_s16, %s315_s16 }
  0x1d   :  { %p322_p0 = por %p321_p13, %p320_p12 }
  0x1f   :  { %p323_p1 = pnand %p322_p0, %p316_p11 }
  0x21   :  { %326 = shalt.err (!%p323_p1)
}
  0x22   :  { %36 = dma.hbm_to_vmem [thread:$0]  %s458_s1, 512, %s31_s8, [#allocation7], %s356_s28, %s356_s28, %s357_s29  }
  0x23   :  { %349 = dma.done.wait [#allocation4], 256  }
  0x24   :  { %350 = vsyncadd [#allocation4], 4294967040 }
  0x25   :  { %351 = dma.done.wait [#allocation7], 512  }
  0x26   :  { %352 = vsyncadd [#allocation7], 4294966784  ;;  %vm53_vm0 = vcmask 261120   ;;  %v359_v0 = vmov 0.0   ;;  %v60_v1 = vld [vmem:[#allocation6] sm:$0xff]  ;;  %v61_v2 = vld [vmem:[#allocation6 + $0x8] sm:$0xff] }
  0x27   :  { %55 = vst.msk [vmem:[#allocation2 + $0x8] sm:$0xff] %vm53_vm0, %v359_v0  ;;  %54 = vst.msk [vmem:[#allocation2] sm:$0xff] %vm53_vm0, %v359_v0  ;;  %v62_v3 = vld [vmem:[#allocation6 + $0x10] sm:$0xff]  ;;  %v261_v4 = vpack.c.bf16 %v61_v2, %v60_v1  ;;  %v63_v5 = vld [vmem:[#allocation6 + $0x18] sm:$0xff]  ;;  %s360_s22 = smov [#allocation8]  }
  0x28   :  { %v58_v6 = vld [vmem:[#allocation3] sm:$0xff]  ;;  %v265_v7 = vpack.c.bf16 %v63_v5, %v62_v3  ;;  %v59_v8 = vld [vmem:[#allocation3 + $0x8] sm:$0xff]  ;;  %v241_v15 = vld [vmem:[%s459_s2] ss:$0 sm:$0xff]  ;;  %s226_s23 = sshll.u32 %s360_s22, 4  ;;  %s227_s23 = int_to_ptr.vmem [resolvable:$true] %s226_s23 }
  0x29   :  { %258 = vmatprep.mubr.msk.f32.mxu0 %vm53_vm0, %v58_v6  ;;  %262 = vmatprep.subr.bf16.mxu0 %v261_v4  ;;  %v242_v49 = vld [vmem:[%s460_s3] ss:$0 sm:$0xff]  ;;  %s327_s24 = scalar_lea.vmem %s227_s23, 256  ;;  %p332_p3 = scmp.lt.s32.totalorder %s227_s23, %s227_s23 }
  0x2a   :  { %264 = vmatpush3.bf16.msra.mxu0 %v261_v4  ;;  %v243_v51 = vld [vmem:[%s461_s4] ss:$0 sm:$0xff]  ;;  %p328_p2 = scmp.ne.s32.totalorder %s227_s23, %s327_s24  ;;  %p333_p4 = scmp.lt.s32.totalorder %s327_s24, %s327_s24 }
  0x2b   :  { %266 = vmatprep.subr.bf16.mxu0 %v265_v7 }
  0x2c   :  { %p334_p5 = por %p333_p4, %p332_p3 }
  0x2e   :  { %268 = vmatpush3.bf16.msra.mxu0 %v265_v7  ;;  %v57_v9 = vld [vmem:[#allocation2 + $0x8] sm:$0xff]  ;;  %v56_v10 = vld [vmem:[#allocation2] sm:$0xff]  ;;  %p335_p6 = pnand %p334_p5, %p328_p2 }
  0x31   :  { %259 = vmatmul.mubr.msk.f32.vlgmr.msra.gmra.mrb[0].mxu0 %vm53_vm0, %v59_v8 }
 0x104   :  { %v260_v11 = vpop.f32.mrb[0].mxu0 }
 0x105   :  { %v147_v12 = vadd.f32 %v260_v11, %v57_v9  ;;  %v137_v13 = vpop.f32.mrb[1].mxu0 }
 0x106   :  { %v146_v14 = vadd.f32 %v137_v13, %v56_v10 }
 0x107   :  { %149 = vst.msk [vmem:[#allocation2 + $0x8] sm:$0xff] %vm53_vm0, %v147_v12 }
 0x108   :  { %148 = vst.msk [vmem:[#allocation2] sm:$0xff] %vm53_vm0, %v146_v14 }
 0x10e   :  { %v154_v16 = vld [vmem:[#allocation2 + $0x8] sm:$0xff] }
 0x10f   :  { %v153_v17 = vld [vmem:[#allocation2] sm:$0xff]  ;;  %v163_v18 = vadd.f32 %v241_v15, %v154_v16 }
 0x110   :  { %v162_v19 = vadd.f32 %v241_v15, %v153_v17 }
 0x111   :  { %v167_v20 = vmul.f32 0.70710677, %v163_v18  ;;  %v165_v28 = vmul.f32 0.5, %v163_v18 }
 0x112   :  { %v166_v21 = vmul.f32 0.70710677, %v162_v19  ;;  %v164_v24 = vmul.f32 0.5, %v162_v19 }
 0x113   :  { %275 = verf.f32 %v167_v20 }
 0x114   :  { %277 = verf.f32 %v166_v21 }
 0x11d   :  { %v276_v22 = vpop.eup %275 }
 0x11e   :  { %v278_v23 = vpop.eup %277  ;;  %v171_v26 = vadd.f32 1.0, %v276_v22 }
 0x11f   :  { %v170_v25 = vadd.f32 1.0, %v278_v23 }
 0x120   :  { %v173_v30 = vmul.f32 %v171_v26, %v165_v28 }
 0x121   :  { %v172_v27 = vmul.f32 %v170_v25, %v164_v24 }
 0x122   :  { %v177_v31 = vsel %vm53_vm0, %v173_v30, 0.0 }
 0x123   :  { %v174_v29 = vsel %vm53_vm0, %v172_v27, 0.0 }
 0x124   :  { %175 = vadd.xlane.f32.xlu0 %v174_v29 }
 0x128   :  { %178 = vadd.xlane.f32.xlu0 %v177_v31 }
 0x1b1   :  { %v176_v32 = vpop.xlane.xlu0 %175 }
 0x1b2   :  { %v181_v33 = vmul.f32 0.03125, %v176_v32 }
 0x1b4   :  { %v183_v34 = vsub.f32 %v172_v27, %v181_v33 }
 0x1b5   :  { %v179_v35 = vpop.xlane.xlu0 %178 }
 0x1b6   :  { %v182_v36 = vmul.f32 0.03125, %v179_v35  ;;  %v185_v37 = vmul.f32 %v183_v34, %v183_v34 }
 0x1b8   :  { %v184_v38 = vsub.f32 %v173_v30, %v182_v36  ;;  %v187_v39 = vsel %vm53_vm0, %v185_v37, 0.0 }
 0x1b9   :  { %188 = vadd.xlane.f32.xlu1 %v187_v39 }
 0x1ba   :  { %v186_v40 = vmul.f32 %v184_v38, %v184_v38 }
 0x1bc   :  { %v190_v41 = vsel %vm53_vm0, %v186_v40, 0.0 }
 0x1bd   :  { %191 = vadd.xlane.f32.xlu1 %v190_v41 }
 0x246   :  { %v189_v42 = vpop.xlane.xlu1 %188 }
 0x247   :  { %v193_v43 = vmul.f32 0.03125, %v189_v42 }
 0x249   :  { %v195_v44 = vadd.f32 1e-06, %v193_v43 }
 0x24a   :  { %v192_v45 = vpop.xlane.xlu1 %191 }
 0x24b   :  { %279 = vrsqrt.f32 %v195_v44  ;;  %v194_v46 = vmul.f32 0.03125, %v192_v45 }
 0x24d   :  { %v196_v47 = vadd.f32 1e-06, %v194_v46 }
 0x24f   :  { %281 = vrsqrt.f32 %v196_v47 }
 0x255   :  { %v280_v48 = vpop.eup %279 }
 0x256   :  { %v199_v50 = vmul.f32 %v280_v48, %v183_v34 }
 0x258   :  { %v208_v52 = vmul.f32 %v242_v49, %v199_v50 }
 0x259   :  { %v282_v53 = vpop.eup %281 }
 0x25a   :  { %v200_v54 = vmul.f32 %v282_v53, %v184_v38  ;;  %v217_v55 = vadd.f32 %v243_v51, %v208_v52 }
 0x25c   :  { %v209_v56 = vmul.f32 %v242_v49, %v200_v54  ;;  %219 = vst.msk [vmem:[#allocation8] sm:$0xff] %vm53_vm0, %v217_v55 }
 0x25e   :  { %v218_v57 = vadd.f32 %v243_v51, %v209_v56 }
 0x260   :  { %220 = vst.msk [vmem:[#allocation8 + $0x8] sm:$0xff] %vm53_vm0, %v218_v57 }
 0x261   :  { %338 = shalt.err (!%p335_p6)
}
 0x262   :  { %s339_s25 = scalar_lea.hbm %s462_s5, 256 }
 0x263   :  { %p340_p7 = scmp.ne.s32.totalorder %s462_s5, %s339_s25  ;;  %p343_p8 = scmp.lt.u32.totalorder %s339_s25, %s462_s5 }
 0x265   :  { %p345_p9 = pnand %p343_p8, %p340_p7 }
 0x267   :  { %348 = shalt.err (!%p345_p9)
}
 0x268   :  { %232 = dma.vmem_to_hbm [thread:$0]  %s227_s23, 256, %s462_s5, [#allocation5], %s356_s28, %s356_s28, %s357_s29  }
 0x269   :  { %353 = dma.done.wait [#allocation5], 256  }
 0x26a   :  { %354 = vsyncadd [#allocation5], 4294967040 }
 0x26b   :  { %236 = vsyncpa [#allocation4], 1 }
 0x26c   :  { %237 = vsyncpa [#allocation7], 1 }
 0x26d   :  { %238 = vsyncpa [#allocation5], 1 }

</bundles_post_ra>
